<compile_context>
chip_gen: v7x
topology: tpu7x:2x2x1
jax: 0.10.0
libtpu: 0.0.40
codegen_flags: <defaults>
</compile_context>

<pallas_src>
import functools

import jax
import jax.numpy as jnp
from jax import lax
from jax.experimental import pallas as pl
from jax.experimental.pallas import tpu as pltpu

LANES = 128        # vreg lane width
SUBLANES = 8       # f32 vreg sublanes
ROW_ALIGN = 16     # block sublane alignment (16 keeps bf16 inputs legal too)
TM_MAX = 8192      # rows per grid step: 8192*128*4B = 4 MiB per f32 input tile
NCORES = 2         # leading "parallel" grid axis; sequential (and ~free) on 1-TC chips


def _cdiv(a, b):
    return (a + b - 1) // b


def _round_down(a, b):
    return (a // b) * b


def _charbonnier_sum_kernel(x_ref, y_ref, o_ref, acc_ref, *,
                            eps2, rows, tm, steps, needs_mask):
    c = pl.program_id(0)
    i = pl.program_id(1)

    @pl.when(i == 0)
    def _():
        acc_ref[...] = jnp.zeros_like(acc_ref)

    x = x_ref[...].astype(jnp.float32)
    y = y_ref[...].astype(jnp.float32)
    diff = x - y
    # TODO(synk): if profiling shows the single EUP slot binding on v7x, do the
    # sqrt in bf16 (numerics change, so gated on a measurement).
    val = jnp.sqrt(diff * diff + jnp.float32(eps2))          # (tm, 128) f32

    def fold(v):
        # Pure-VPU fold of (tm, 128) into one (8, 128) vreg; the reshape is a
        # vreg-exact reinterpretation (rows 8k..8k+7 are already one vreg).
        return v.reshape(tm // SUBLANES, SUBLANES, LANES).sum(axis=0)

    if needs_mask:
        # Only the final (OOB-padded or clamped-redundant) block per core needs
        # masking; every full block stays on the cheap unmasked path.
        row_start = (c * steps + i) * tm       # logical (unclamped) row offset

        @pl.when(row_start + tm <= rows)
        def _():
            acc_ref[...] += fold(val)

        @pl.when(row_start + tm > rows)
        def _():
            rid = lax.broadcasted_iota(jnp.int32, (tm, LANES), 0) + row_start
            acc_ref[...] += fold(jnp.where(rid < rows, val, 0.0))
    else:
        acc_ref[...] += fold(val)

    @pl.when(i == pl.num_programs(1) - 1)
    def _():
        # Lane-dense (1, 8, 128) store; cross-lane reduce happens outside.
        o_ref[...] = acc_ref[...][None]


def _charbonnier_bulk_sum(x2, y2, eps2, tm_max):
    """Sum of Charbonnier values over a (rows, 128) view; rows need not divide tm."""
    rows = x2.shape[0]
    # Largest aligned tile <= rows (blocks never exceed the array extent); at
    # TM_MAX that is 4 MiB per input tile, amortizing the per-step overhead.
    tm = min(tm_max, _round_down(rows, ROW_ALIGN))
    total_blocks = _cdiv(rows, tm)
    ncores = NCORES if total_blocks >= NCORES else 1
    steps = _cdiv(total_blocks, ncores)
    needs_mask = (ncores * steps * tm != rows)
    max_block = total_blocks - 1

    def in_map(c, i):
        # Clamp so a core whose last logical block falls entirely past the end
        # just re-reads the final valid block (its rows are masked to zero).
        return (jnp.minimum(c * steps + i, max_block), 0)

    kernel = functools.partial(
        _charbonnier_sum_kernel,
        eps2=eps2, rows=rows, tm=tm, steps=steps, needs_mask=needs_mask)

    n_elems = rows * LANES
    nbytes = n_elems * (x2.dtype.itemsize + y2.dtype.itemsize)

    partials = pl.pallas_call(
        kernel,
        out_shape=jax.ShapeDtypeStruct((ncores, SUBLANES, LANES), jnp.float32),
        grid_spec=pltpu.PrefetchScalarGridSpec(
            num_scalar_prefetch=0,
            grid=(ncores, steps),
            in_specs=[
                pl.BlockSpec((tm, LANES), in_map),
                pl.BlockSpec((tm, LANES), in_map),
            ],
            out_specs=pl.BlockSpec((1, SUBLANES, LANES), lambda c, i: (c, 0, 0)),
            scratch_shapes=[pltpu.VMEM((SUBLANES, LANES), jnp.float32)],
        ),
        compiler_params=pltpu.CompilerParams(
            dimension_semantics=("parallel", "arbitrary"),
            # Worst case 2 inputs x 2 pipeline buffers x 4 MiB = 16 MiB; 32 MiB
            # gives headroom and is legal on v5e/v6e (128 MiB) and v7x (64 MiB).
            vmem_limit_bytes=32 * 1024 * 1024,
        ),
        cost_estimate=pl.CostEstimate(
            flops=4 * n_elems,
            transcendentals=n_elems,
            bytes_accessed=nbytes + 4 * ncores * SUBLANES * LANES,
        ),
    )(x2, y2)
    return jnp.sum(partials, dtype=jnp.float32)


def _canon(a):
    a = jnp.asarray(a)
    if a.dtype not in (jnp.dtype(jnp.float32), jnp.dtype(jnp.bfloat16),
                       jnp.dtype(jnp.float16)):
        a = a.astype(jnp.float32)
    return a


def charbonnier_loss(x, y, eps=1e-3, *, tm_max=TM_MAX):
    x = _canon(x)
    y = _canon(y)
    assert x.shape == y.shape
    assert tm_max % ROW_ALIGN == 0
    n = x.size
    eps2 = float(eps) * float(eps)

    xf = jnp.ravel(x)
    yf = jnp.ravel(y)

    if n % LANES != 0 or n < LANES * ROW_ALIGN:
        # TODO(synk): lane-unaligned (or tiny) inputs still bypass the kernel; a
        # copy-free in-kernel treatment needs 1-D blocks / manual DMA with
        # element masking.  Plain XLA runs this memory-bound case at roofline
        # and avoids the hidden near-full-tensor slice copy the old path paid.
        d = xf.astype(jnp.float32) - yf.astype(jnp.float32)
        return jnp.mean(jnp.sqrt(d * d + jnp.float32(eps2)))

    rows = n // LANES
    x2 = xf.reshape(rows, LANES)   # free reshape; no copies anywhere on this path
    y2 = yf.reshape(rows, LANES)
    total = _charbonnier_bulk_sum(x2, y2, eps2, tm_max)
    return total / jnp.float32(n)


if __name__ == "__main__":
    def ref_loss(a, b, eps=1e-3):
        d = a.astype(jnp.float32) - b.astype(jnp.float32)
        return jnp.mean(jnp.sqrt(d * d + jnp.float32(eps * eps)))

    keys = jax.random.split(jax.random.PRNGKey(0), 8)

    # 1) Small NCHW input (same convention as the PyTorch module): single block.
    x = jax.random.normal(keys[0], (2, 4, 16, 16), dtype=jnp.float32)
    y = jax.random.normal(keys[1], (2, 4, 16, 16), dtype=jnp.float32)
    loss = charbonnier_loss(x, y, eps=1e-3)
    jax.block_until_ready(loss)
    ref = ref_loss(x, y)
    assert jnp.allclose(loss, ref, rtol=1e-5, atol=1e-6), (loss, ref)

    # 2) Larger lane-aligned input: one bigger lane-dense tile, no tail launch.
    xb = jax.random.normal(keys[2], (4, 4, 128, 130), dtype=jnp.float32)
    yb = jax.random.normal(keys[3], (4, 4, 128, 130), dtype=jnp.float32)
    loss_b = charbonnier_loss(xb, yb, eps=1e-3)
    jax.block_until_ready(loss_b)
    ref_b = ref_loss(xb, yb)
    assert jnp.allclose(loss_b, ref_b, rtol=1e-4, atol=1e-6), (loss_b, ref_b)

    # 3) Multi-step grid + 2-way core split + masked partial block (small tile
    #    override so the masking / clamping paths are exercised at small size).
    xm = jax.random.normal(keys[4], (2, 3, 40, 64), dtype=jnp.float32)
    ym = jax.random.normal(keys[5], (2, 3, 40, 64), dtype=jnp.float32)
    loss_m = charbonnier_loss(xm, ym, eps=1e-3, tm_max=32)
    jax.block_until_ready(loss_m)
    ref_m = ref_loss(xm, ym)
    assert jnp.allclose(loss_m, ref_m, rtol=1e-5, atol=1e-6), (loss_m, ref_m)
    # Same data, tile choice that leaves one core with a fully clamped block.
    loss_m2 = charbonnier_loss(xm, ym, eps=1e-3, tm_max=48)
    jax.block_until_ready(loss_m2)
    assert jnp.allclose(loss_m2, ref_m, rtol=1e-5, atol=1e-6), (loss_m2, ref_m)

    # 4) Lane-unaligned input: copy-free plain-JAX fallback path.
    xu = jax.random.normal(keys[6], (2, 4, 16, 17), dtype=jnp.float32)
    yu = jax.random.normal(keys[7], (2, 4, 16, 17), dtype=jnp.float32)
    loss_u = charbonnier_loss(xu, yu, eps=1e-3)
    jax.block_until_ready(loss_u)
    ref_u = ref_loss(xu, yu)
    assert jnp.allclose(loss_u, ref_u, rtol=1e-5, atol=1e-6), (loss_u, ref_u)

    print("KERNEL_OK")
</pallas_src>

<mosaic_0001>
module attributes {stable_mosaic.version = 11 : i64} {
  func.func @_charbonnier_sum_kernel(%arg0: i32, %arg1: i32, %arg2: memref<16x128xf32, #tpu.memory_space<vmem>>, %arg3: memref<16x128xf32, #tpu.memory_space<vmem>>, %arg4: memref<1x8x128xf32, #tpu.memory_space<vmem>>, %arg5: memref<8x128xf32, #tpu.memory_space<vmem>>) attributes {dimension_semantics = [#tpu.dimension_semantics<parallel>, #tpu.dimension_semantics<arbitrary>], iteration_bounds = array<i64: 1, 1>, scalar_prefetch = 0 : i64, scratch_operands = 1 : i64, tpu.core_type = #tpu.core_type<tc>, window_params = [{transform_indices = @transform_0, window_bounds = array<i64: 16, 128>}, {transform_indices = @transform_1, window_bounds = array<i64: 16, 128>}, {transform_indices = @transform_2, window_bounds = array<i64: 1, 8, 128>}]} {
    %c0_i32 = arith.constant 0 : i32
    %0 = arith.cmpi eq, %arg1, %c0_i32 : i32
    %1 = arith.extui %0 : i1 to i32
    %c0_i32_0 = arith.constant 0 : i32
    %2 = arith.cmpi ne, %1, %c0_i32_0 : i32
    scf.if %2 {
      %cst_11 = arith.constant 0.000000e+00 : f32
      %18 = vector.broadcast %cst_11 : f32 to vector<8x128xf32>
      %c0_12 = arith.constant 0 : index
      %c0_13 = arith.constant 0 : index
      %19 = vector.load %arg5[%c0_12, %c0_13] : memref<8x128xf32, #tpu.memory_space<vmem>>, vector<8x128xf32>
      tpu.vector_store %arg5[%c0_12, %c0_13], %18 {strides = array<i32>} : memref<8x128xf32, #tpu.memory_space<vmem>>, vector<8x128xf32>,
    } else {
    }
    %c0 = arith.constant 0 : index
    %c0_1 = arith.constant 0 : index
    %3 = vector.load %arg2[%c0, %c0_1] : memref<16x128xf32, #tpu.memory_space<vmem>>, vector<16x128xf32>
    %c0_2 = arith.constant 0 : index
    %c0_3 = arith.constant 0 : index
    %4 = vector.load %arg3[%c0_2, %c0_3] : memref<16x128xf32, #tpu.memory_space<vmem>>, vector<16x128xf32>
    %5 = arith.subf %3, %4 : vector<16x128xf32>
    %6 = arith.mulf %5, %5 : vector<16x128xf32>
    %cst = arith.constant 9.99999997E-7 : f32
    %7 = vector.broadcast %cst : f32 to vector<16x128xf32>
    %8 = arith.addf %6, %7 : vector<16x128xf32>
    %9 = math.sqrt %8 : vector<16x128xf32>
    %c0_4 = arith.constant 0 : index
    %c0_5 = arith.constant 0 : index
    %10 = vector.load %arg5[%c0_4, %c0_5] : memref<8x128xf32, #tpu.memory_space<vmem>>, vector<8x128xf32>
    %11 = vector.shape_cast %9 : vector<16x128xf32> to vector<2x8x128xf32>
    %cst_6 = arith.constant dense<0.000000e+00> : vector<8x128xf32>
    %12 = vector.multi_reduction <add>, %11, %cst_6 [0] : vector<2x8x128xf32> to vector<8x128xf32>
    %13 = arith.addf %10, %12 : vector<8x128xf32>
    %c0_7 = arith.constant 0 : index
    %c0_8 = arith.constant 0 : index
    %14 = vector.load %arg5[%c0_7, %c0_8] : memref<8x128xf32, #tpu.memory_space<vmem>>, vector<8x128xf32>
    tpu.vector_store %arg5[%c0_7, %c0_8], %13 {strides = array<i32>} : memref<8x128xf32, #tpu.memory_space<vmem>>, vector<8x128xf32>,
    %c0_i32_9 = arith.constant 0 : i32
    %15 = arith.cmpi eq, %arg1, %c0_i32_9 : i32
    %16 = arith.extui %15 : i1 to i32
    %c0_i32_10 = arith.constant 0 : i32
    %17 = arith.cmpi ne, %16, %c0_i32_10 : i32
    scf.if %17 {
      %c0_11 = arith.constant 0 : index
      %c0_12 = arith.constant 0 : index
      %18 = vector.load %arg5[%c0_11, %c0_12] : memref<8x128xf32, #tpu.memory_space<vmem>>, vector<8x128xf32>
      %19 = vector.shape_cast %18 : vector<8x128xf32> to vector<1x8x128xf32>
      %c0_13 = arith.constant 0 : index
      %c0_14 = arith.constant 0 : index
      %c0_15 = arith.constant 0 : index
      %20 = vector.load %arg4[%c0_13, %c0_14, %c0_15] : memref<1x8x128xf32, #tpu.memory_space<vmem>>, vector<1x8x128xf32>
      tpu.vector_store %arg4[%c0_13, %c0_14, %c0_15], %19 {strides = array<i32>} : memref<1x8x128xf32, #tpu.memory_space<vmem>>, vector<1x8x128xf32>,
    } else {
    }
    return
  }
  func.func @transform_0(%arg0: i32, %arg1: i32) -> (i32, i32) {
    %c1_i32 = arith.constant 1 : i32
    %0 = arith.muli %arg0, %c1_i32 : i32
    %1 = arith.addi %0, %arg1 : i32
    %c0_i32 = arith.constant 0 : i32
    %2 = arith.minsi %1, %c0_i32 : i32
    %c0_i32_0 = arith.constant 0 : i32
    %c0_i32_1 = arith.constant 0 : i32
    return %2, %c0_i32_0 : i32, i32
  }
  func.func @transform_1(%arg0: i32, %arg1: i32) -> (i32, i32) {
    %c1_i32 = arith.constant 1 : i32
    %0 = arith.muli %arg0, %c1_i32 : i32
    %1 = arith.addi %0, %arg1 : i32
    %c0_i32 = arith.constant 0 : i32
    %2 = arith.minsi %1, %c0_i32 : i32
    %c0_i32_0 = arith.constant 0 : i32
    %c0_i32_1 = arith.constant 0 : i32
    return %2, %c0_i32_0 : i32, i32
  }
  func.func @transform_2(%arg0: i32, %arg1: i32) -> (i32, i32, i32) {
    %c0_i32 = arith.constant 0 : i32
    %c0_i32_0 = arith.constant 0 : i32
    %c0_i32_1 = arith.constant 0 : i32
    return %arg0, %c0_i32, %c0_i32_0 : i32, i32, i32
  }
}

</mosaic_0001>

<bundles_post_ra>
// kernel: tpu_custom_call.1
= control target key start
LH: loop header
LB: loop body
LE: loop exit
PB: predicated region body
PF: predicated region fallthrough
CT: control target
= control target key end

     0   :  { %7 = vsyncpa [#allocation4], 0  ;;  %s255_s0 = inlined_call_operand.hbm [shape: f32[16,128], index: 0, kind: input, shape index: {}]   ;;  %s256_s1 = inlined_call_operand.hbm [shape: f32[16,128], index: 1, kind: input, shape index: {}]   ;;  %s257_s2 = inlined_call_operand.hbm [shape: f32[1,8,128], index: 2, kind: output, shape index: {}]  }
   0x1   :  { %8 = vsyncpa [#allocation7], 0 }
   0x2   :  { %9 = vsyncpa [#allocation5], 0  ;;  %s199_s9 = smov [#allocation3]   ;;  %s127_s13 = scalar_lea.hbm %s255_s0, 256 }
   0x3   :  { %s21_s10 = sshll.u32 %s199_s9, 4  ;;  %p128_p0 = scmp.ne.s32.totalorder %s255_s0, %s127_s13  ;;  %s22_s10 = int_to_ptr.vmem [resolvable:$true] %s21_s10 }
   0x4   :  { %p131_p1 = scmp.lt.u32.totalorder %s127_s13, %s255_s0 }
   0x6   :  { %p133_p2 = pnand %p131_p1, %p128_p0 }
   0x8   :  { %136 = shalt.err (!%p133_p2)
}
   0x9   :  { %s137_s18 = scalar_lea.vmem %s22_s10, 256  ;;  %p142_p4 = scmp.lt.s32.totalorder %s22_s10, %s22_s10 }
   0xa   :  { %p138_p3 = scmp.ne.s32.totalorder %s22_s10, %s137_s18  ;;  %p143_p5 = scmp.lt.s32.totalorder %s137_s18, %s137_s18 }
   0xc   :  { %p144_p6 = por %p143_p5, %p142_p4 }
   0xe   :  { %p145_p7 = pnand %p144_p6, %p138_p3 }
  0x10   :  { %148 = shalt.err (!%p145_p7)
}
  0x11   :  { %s200_s19 = smov 128   ;;  %s201_s20 = smov 8  }
  0x12   :  { %27 = dma.hbm_to_vmem [thread:$0]  %s255_s0, 256, %s22_s10, [#allocation4], %s200_s19, %s200_s19, %s201_s20  }
  0x13   :  { %s202_s23 = smov [#allocation6]   ;;  %s149_s27 = scalar_lea.hbm %s256_s1, 256 }
  0x14   :  { %s39_s24 = sshll.u32 %s202_s23, 4  ;;  %p150_p8 = scmp.ne.s32.totalorder %s256_s1, %s149_s27  ;;  %s40_s24 = int_to_ptr.vmem [resolvable:$true] %s39_s24 }
  0x15   :  { %p153_p9 = scmp.lt.u32.totalorder %s149_s27, %s256_s1 }
  0x17   :  { %p155_p10 = pnand %p153_p9, %p150_p8 }
  0x19   :  { %158 = shalt.err (!%p155_p10)
}
  0x1a   :  { %s159_s4 = scalar_lea.vmem %s40_s24, 256  ;;  %p164_p12 = scmp.lt.s32.totalorder %s40_s24, %s40_s24 }
  0x1b   :  { %p160_p11 = scmp.ne.s32.totalorder %s40_s24, %s159_s4  ;;  %p165_p13 = scmp.lt.s32.totalorder %s159_s4, %s159_s4 }
  0x1d   :  { %p166_p0 = por %p165_p13, %p164_p12 }
  0x1f   :  { %p167_p1 = pnand %p166_p0, %p160_p11 }
  0x21   :  { %170 = shalt.err (!%p167_p1)
}
  0x22   :  { %45 = dma.hbm_to_vmem [thread:$0]  %s256_s1, 256, %s40_s24, [#allocation7], %s200_s19, %s200_s19, %s201_s20  }
  0x23   :  { %193 = dma.done.wait [#allocation4], 256  }
  0x24   :  { %194 = vsyncadd [#allocation4], 4294967040 }
  0x25   :  { %195 = dma.done.wait [#allocation7], 256  }
  0x26   :  { %196 = vsyncadd [#allocation7], 4294967040  ;;  %v65_v0 = vld [vmem:[#allocation3] sm:$0xff]  ;;  %v66_v1 = vld [vmem:[#allocation3 + $0x8] sm:$0xff]  ;;  %s203_s1 = smov [#allocation8]  }
  0x27   :  { %v67_v2 = vld [vmem:[#allocation6] sm:$0xff]  ;;  %v68_v3 = vld [vmem:[#allocation6 + $0x8] sm:$0xff]  ;;  %s104_s6 = sshll.u32 %s203_s1, 4  ;;  %s105_s6 = int_to_ptr.vmem [resolvable:$true] %s104_s6 }
  0x28   :  { %v69_v4 = vsub.f32 %v65_v0, %v67_v2  ;;  %v70_v5 = vsub.f32 %v66_v1, %v68_v3  ;;  %s171_s7 = scalar_lea.vmem %s105_s6, 128  ;;  %p176_p3 = scmp.lt.s32.totalorder %s105_s6, %s105_s6 }
  0x29   :  { %p172_p2 = scmp.ne.s32.totalorder %s105_s6, %s171_s7  ;;  %p177_p4 = scmp.lt.s32.totalorder %s171_s7, %s171_s7 }
  0x2a   :  { %v71_v6 = vmul.f32 %v69_v4, %v69_v4  ;;  %v72_v7 = vmul.f32 %v70_v5, %v70_v5 }
  0x2b   :  { %p178_p5 = por %p177_p4, %p176_p3 }
  0x2c   :  { %v73_v8 = vadd.f32 1e-06, %v71_v6  ;;  %v74_v9 = vadd.f32 1e-06, %v72_v7 }
  0x2d   :  { %p179_p6 = pnand %p178_p5, %p172_p2 }
  0x2e   :  { %123 = vrsqrt.f32 %v73_v8  ;;  %vm77_vm0 = vcmp.eq.f32.partialorder %v73_v8, inf  ;;  %v80_v11 = vand.u32 2147483648, %v73_v8  ;;  %vm79_vm1 = vcmp.eq.f32.partialorder %v73_v8, 0.0 }
  0x2f   :  { %125 = vrsqrt.f32 %v74_v9  ;;  %vm84_vm2 = vcmp.eq.f32.partialorder %v74_v9, inf  ;;  %v87_v14 = vand.u32 2147483648, %v74_v9  ;;  %vm86_vm3 = vcmp.eq.f32.partialorder %v74_v9, 0.0 }
  0x38   :  { %v124_v10 = vpop.eup %123 }
  0x39   :  { %v126_v12 = vpop.eup %125  ;;  %v76_v13 = vmul.f32 %v124_v10, %v73_v8 }
  0x3a   :  { %v83_v15 = vmul.f32 %v126_v12, %v74_v9 }
  0x3b   :  { %v78_v16 = vsel %vm77_vm0, %v73_v8, %v76_v13 }
  0x3c   :  { %v81_v17 = vsel %vm79_vm1, %v80_v11, %v78_v16  ;;  %v85_v18 = vsel %vm84_vm2, %v74_v9, %v83_v15 }
  0x3d   :  { %v88_v19 = vsel %vm86_vm3, %v87_v14, %v85_v18 }
  0x3e   :  { %v90_v20 = vadd.f32 %v88_v19, %v81_v17 }
  0x40   :  { %97 = vst [vmem:[#allocation8] sm:$0xff] %v90_v20 }
  0x41   :  { %182 = shalt.err (!%p179_p6)
}
  0x42   :  { %s183_s10 = scalar_lea.hbm %s257_s2, 128 }
  0x43   :  { %p184_p7 = scmp.ne.s32.totalorder %s257_s2, %s183_s10  ;;  %p187_p8 = scmp.lt.u32.totalorder %s183_s10, %s257_s2 }
  0x45   :  { %p189_p9 = pnand %p187_p8, %p184_p7 }
  0x47   :  { %192 = shalt.err (!%p189_p9)
}
  0x48   :  { %107 = dma.vmem_to_hbm [thread:$0]  %s105_s6, 128, %s257_s2, [#allocation5]  }
  0x49   :  { %197 = dma.done.wait [#allocation5], 128  }
  0x4a   :  { %198 = vsyncadd [#allocation5], 4294967168 }
  0x4b   :  { %111 = vsyncpa [#allocation4], 1 }
  0x4c   :  { %112 = vsyncpa [#allocation7], 1 }
  0x4d   :  { %113 = vsyncpa [#allocation5], 1 }

</bundles_post_ra>
